<compile_context>
chip_gen: v7x
topology: tpu7x:2x2x1
jax: 0.10.0
libtpu: 0.0.40
codegen_flags: <defaults>
</compile_context>

<pallas_src>
import jax
import jax.numpy as jnp
from jax import lax
from jax.experimental import pallas as pl
from jax.experimental.pallas import tpu as pltpu

MODES1 = 12
MODES2 = 12


def _spectral_mix_kernel(xr_ref, xi_ref, wr_ref, wi_ref, or_ref, oi_ref):
    """out[b,o,f] = sum_i x[b,i,f] * w[i,o,f]   (complex, split re/im planes).

    Shapes inside the kernel:
      xr/xi : (TB, I, F)   -- one batch tile, lane-dense flattened frequency axis F
      wr/wi : (I,  O, F)   -- resident across the whole grid (constant index_map)
      out   : (TB, O, F)
    """
    in_ch = xr_ref.shape[1]
    acc_shape = or_ref.shape  # (TB, O, F)

    def accumulate(acc_r, acc_i, xr_i, xi_i, wr_i, wi_i):
        # xr_i/xi_i: (TB, 1, F); wr_i/wi_i: (1, O, F) -> broadcast to (TB, O, F)
        acc_r = acc_r + xr_i * wr_i - xi_i * wi_i
        acc_i = acc_i + xr_i * wi_i + xi_i * wr_i
        return acc_r, acc_i

    acc_r = jnp.zeros(acc_shape, jnp.float32)
    acc_i = jnp.zeros(acc_shape, jnp.float32)

    if in_ch <= 8:
        # Tiny channel count: static unroll with static per-step ref slices.
        for i in range(in_ch):
            acc_r, acc_i = accumulate(
                acc_r, acc_i,
                xr_ref[:, i, :][:, None, :], xi_ref[:, i, :][:, None, :],
                wr_ref[i][None, :, :], wi_ref[i][None, :, :])
    else:
        # Realistic FNO channel counts: fori_loop keeps the live vreg set bounded.
        def body(i, carry):
            a_r, a_i = carry
            return accumulate(
                a_r, a_i,
                xr_ref[:, pl.ds(i, 1), :], xi_ref[:, pl.ds(i, 1), :],
                wr_ref[i][None, :, :], wi_ref[i][None, :, :])
        acc_r, acc_i = lax.fori_loop(0, in_ch, body, (acc_r, acc_i), unroll=4)

    or_ref[...] = acc_r
    oi_ref[...] = acc_i


def _pick_block_b(B, I, O, F, budget_bytes=16 * 1024 * 1024):
    """Largest divisor of B whose VMEM footprint (resident weights + double-buffered
    re/im input + output tiles) fits the budget; prefer tilings that leave >= 2 grid
    steps so the DMA pipeline actually overlaps."""
    w_bytes = 2 * 2 * I * O * F * 4            # (maybe double-buffered) re+im weights
    per_row = 2 * 2 * (I + O) * F * 4          # double-buffer * (re+im) * f32 per batch row
    divisors = [d for d in range(1, B + 1) if B % d == 0]
    fits = [d for d in divisors if w_bytes + d * per_row <= budget_bytes] or [1]
    multi = [d for d in fits if B // d >= 2]
    return max(multi) if multi else max(fits)


def compl_mul2d_pallas(x_low, x_high, weights1, weights2):
    """Fused complex channel-mix for both mode corners.

    x_low/x_high : complex64 (B, I, m1, m2)
    weights1/2   : complex64 (I, O, m1, m2)
    returns      : (out_low, out_high) complex64 (B, O, m1, m2)
    """
    B, I, m1, m2 = x_low.shape
    O = weights1.shape[1]
    F = 2 * m1 * m2  # both corners fused onto the lane axis

    # (corner, m1, m2) flattened identically for activations and weights.
    x_st = jnp.stack([x_low, x_high], axis=2).reshape(B, I, F)
    w_st = jnp.stack([weights1, weights2], axis=2).reshape(I, O, F)

    xr = jnp.real(x_st).astype(jnp.float32)
    xi = jnp.imag(x_st).astype(jnp.float32)
    wr = jnp.real(w_st).astype(jnp.float32)
    wi = jnp.imag(w_st).astype(jnp.float32)

    block_b = _pick_block_b(B, I, O, F)
    grid = (B // block_b,)

    x_spec = pl.BlockSpec((block_b, I, F), lambda b: (b, 0, 0))
    w_spec = pl.BlockSpec((I, O, F), lambda b: (0, 0, 0))       # resident weights
    o_spec = pl.BlockSpec((block_b, O, F), lambda b: (b, 0, 0))

    out_r, out_i = pl.pallas_call(
        _spectral_mix_kernel,
        out_shape=(jax.ShapeDtypeStruct((B, O, F), jnp.float32),
                   jax.ShapeDtypeStruct((B, O, F), jnp.float32)),
        grid=grid,
        in_specs=[x_spec, x_spec, w_spec, w_spec],
        out_specs=(o_spec, o_spec),
        compiler_params=pltpu.CompilerParams(
            dimension_semantics=("parallel",),
            vmem_limit_bytes=32 * 1024 * 1024),
    )(xr, xi, wr, wi)

    out = lax.complex(out_r, out_i).reshape(B, O, 2, m1, m2)
    return out[:, :, 0], out[:, :, 1]


def spectral_conv2d(x, weights1, weights2, modes1=MODES1, modes2=MODES2):
    """x: float32 (B, C_in, H, W) NCHW; weights*: complex64 (C_in, C_out, m1, m2)."""
    B, _, H, W = x.shape
    C_out = weights1.shape[1]
    Wf = W // 2 + 1
    if H < 2 * modes1 or Wf < modes2:
        raise ValueError("spectral_conv2d requires H >= 2*modes1 and W//2+1 >= modes2")

    # TODO(synk): rfft2 / irfft2 have no Pallas TPU primitive; they run as XLA FFT ops.
    x_ft = jnp.fft.rfft2(x)                                   # (B, C_in, H, Wf) complex64

    x_low = x_ft[:, :, :modes1, :modes2]
    x_high = x_ft[:, :, H - modes1:, :modes2]

    out_low, out_high = compl_mul2d_pallas(x_low, x_high, weights1, weights2)

    # Assemble the padded output spectrum directly (no full-size zeros + scatter pass).
    pad_cols = Wf - modes2
    low_band = jnp.pad(out_low, ((0, 0), (0, 0), (0, 0), (0, pad_cols)))
    high_band = jnp.pad(out_high, ((0, 0), (0, 0), (0, 0), (0, pad_cols)))
    mid_band = jnp.zeros((B, C_out, H - 2 * modes1, Wf), dtype=out_low.dtype)
    out_ft = jnp.concatenate([low_band, mid_band, high_band], axis=2)

    return jnp.fft.irfft2(out_ft, s=(H, W))                   # (B, C_out, H, W) f32


if __name__ == "__main__":
    key = jax.random.PRNGKey(0)
    B, C_in, C_out, H, W = 2, 4, 4, 32, 32   # H >= 2*modes1, W//2+1 >= modes2
    k1, k2, k3, k4, k5 = jax.random.split(key, 5)

    scale = 1.0 / (C_in * C_out)
    w_shape = (C_in, C_out, MODES1, MODES2)
    weights1 = (scale * (jax.random.uniform(k1, w_shape)
                         + 1j * jax.random.uniform(k2, w_shape))).astype(jnp.complex64)
    weights2 = (scale * (jax.random.uniform(k3, w_shape)
                         + 1j * jax.random.uniform(k4, w_shape))).astype(jnp.complex64)

    x = jax.random.normal(k5, (B, C_in, H, W), dtype=jnp.float32)

    y = spectral_conv2d(x, weights1, weights2)
    jax.block_until_ready(y)

    # pure-JAX reference for the full forward pass
    def reference(xin):
        x_ft = jnp.fft.rfft2(xin)
        out_ft = jnp.zeros((B, C_out, H, W // 2 + 1), dtype=jnp.complex64)
        out_ft = out_ft.at[:, :, :MODES1, :MODES2].set(
            jnp.einsum('bixy,ioxy->boxy', x_ft[:, :, :MODES1, :MODES2], weights1))
        out_ft = out_ft.at[:, :, -MODES1:, :MODES2].set(
            jnp.einsum('bixy,ioxy->boxy', x_ft[:, :, -MODES1:, :MODES2], weights2))
        return jnp.fft.irfft2(out_ft, s=(H, W))

    y_ref = reference(x)
    assert y.shape == (B, C_out, H, W)
    assert jnp.allclose(y, y_ref, atol=1e-4, rtol=1e-4)
    print("KERNEL_OK")
</pallas_src>

<mosaic_0001>
module attributes {stable_mosaic.version = 11 : i64} {
  func.func @_spectral_mix_kernel(%arg0: i32, %arg1: memref<1x4x288xf32, #tpu.memory_space<vmem>>, %arg2: memref<1x4x288xf32, #tpu.memory_space<vmem>>, %arg3: memref<4x4x288xf32, #tpu.memory_space<vmem>>, %arg4: memref<4x4x288xf32, #tpu.memory_space<vmem>>, %arg5: memref<1x4x288xf32, #tpu.memory_space<vmem>>, %arg6: memref<1x4x288xf32, #tpu.memory_space<vmem>>) attributes {dimension_semantics = [#tpu.dimension_semantics<parallel>], iteration_bounds = array<i64: 2>, scalar_prefetch = 0 : i64, scratch_operands = 0 : i64, tpu.core_type = #tpu.core_type<tc>, window_params = [{transform_indices = @transform_0, window_bounds = array<i64: 1, 4, 288>}, {transform_indices = @transform_1, window_bounds = array<i64: 1, 4, 288>}, {pipeline_mode = #tpu.pipeline_mode<synchronous>, transform_indices = @transform_2, window_bounds = array<i64: 4, 4, 288>}, {pipeline_mode = #tpu.pipeline_mode<synchronous>, transform_indices = @transform_3, window_bounds = array<i64: 4, 4, 288>}, {transform_indices = @transform_4, window_bounds = array<i64: 1, 4, 288>}, {transform_indices = @transform_5, window_bounds = array<i64: 1, 4, 288>}]} {
    %cst = arith.constant 0.000000e+00 : f32
    %0 = vector.broadcast %cst : f32 to vector<1x4x288xf32>
    %cst_0 = arith.constant 0.000000e+00 : f32
    %1 = vector.broadcast %cst_0 : f32 to vector<1x4x288xf32>
    %c0 = arith.constant 0 : index
    %c0_1 = arith.constant 0 : index
    %c0_2 = arith.constant 0 : index
    %2 = vector.load %arg1[%c0, %c0_1, %c0_2] : memref<1x4x288xf32, #tpu.memory_space<vmem>>, vector<1x1x288xf32>
    %3 = vector.shape_cast %2 : vector<1x1x288xf32> to vector<1x288xf32>
    %4 = vector.shape_cast %3 : vector<1x288xf32> to vector<1x1x288xf32>
    %c0_3 = arith.constant 0 : index
    %c0_4 = arith.constant 0 : index
    %c0_5 = arith.constant 0 : index
    %5 = vector.load %arg2[%c0_3, %c0_4, %c0_5] : memref<1x4x288xf32, #tpu.memory_space<vmem>>, vector<1x1x288xf32>
    %6 = vector.shape_cast %5 : vector<1x1x288xf32> to vector<1x288xf32>
    %7 = vector.shape_cast %6 : vector<1x288xf32> to vector<1x1x288xf32>
    %c0_6 = arith.constant 0 : index
    %c0_7 = arith.constant 0 : index
    %c0_8 = arith.constant 0 : index
    %8 = vector.load %arg3[%c0_6, %c0_7, %c0_8] : memref<4x4x288xf32, #tpu.memory_space<vmem>>, vector<1x4x288xf32>
    %9 = vector.shape_cast %8 : vector<1x4x288xf32> to vector<4x288xf32>
    %10 = vector.shape_cast %9 : vector<4x288xf32> to vector<1x4x288xf32>
    %c0_9 = arith.constant 0 : index
    %c0_10 = arith.constant 0 : index
    %c0_11 = arith.constant 0 : index
    %11 = vector.load %arg4[%c0_9, %c0_10, %c0_11] : memref<4x4x288xf32, #tpu.memory_space<vmem>>, vector<1x4x288xf32>
    %12 = vector.shape_cast %11 : vector<1x4x288xf32> to vector<4x288xf32>
    %13 = vector.shape_cast %12 : vector<4x288xf32> to vector<1x4x288xf32>
    %14 = vector.broadcast %4 : vector<1x1x288xf32> to vector<1x4x288xf32>
    %15 = arith.mulf %14, %10 : vector<1x4x288xf32>
    %16 = arith.addf %0, %15 : vector<1x4x288xf32>
    %17 = vector.broadcast %7 : vector<1x1x288xf32> to vector<1x4x288xf32>
    %18 = arith.mulf %17, %13 : vector<1x4x288xf32>
    %19 = arith.subf %16, %18 : vector<1x4x288xf32>
    %20 = vector.broadcast %4 : vector<1x1x288xf32> to vector<1x4x288xf32>
    %21 = arith.mulf %20, %13 : vector<1x4x288xf32>
    %22 = arith.addf %1, %21 : vector<1x4x288xf32>
    %23 = vector.broadcast %7 : vector<1x1x288xf32> to vector<1x4x288xf32>
    %24 = arith.mulf %23, %10 : vector<1x4x288xf32>
    %25 = arith.addf %22, %24 : vector<1x4x288xf32>
    %c0_12 = arith.constant 0 : index
    %c1 = arith.constant 1 : index
    %c0_13 = arith.constant 0 : index
    %26 = vector.load %arg1[%c0_12, %c1, %c0_13] : memref<1x4x288xf32, #tpu.memory_space<vmem>>, vector<1x1x288xf32>
    %27 = vector.shape_cast %26 : vector<1x1x288xf32> to vector<1x288xf32>
    %28 = vector.shape_cast %27 : vector<1x288xf32> to vector<1x1x288xf32>
    %c0_14 = arith.constant 0 : index
    %c1_15 = arith.constant 1 : index
    %c0_16 = arith.constant 0 : index
    %29 = vector.load %arg2[%c0_14, %c1_15, %c0_16] : memref<1x4x288xf32, #tpu.memory_space<vmem>>, vector<1x1x288xf32>
    %30 = vector.shape_cast %29 : vector<1x1x288xf32> to vector<1x288xf32>
    %31 = vector.shape_cast %30 : vector<1x288xf32> to vector<1x1x288xf32>
    %c1_17 = arith.constant 1 : index
    %c0_18 = arith.constant 0 : index
    %c0_19 = arith.constant 0 : index
    %32 = vector.load %arg3[%c1_17, %c0_18, %c0_19] : memref<4x4x288xf32, #tpu.memory_space<vmem>>, vector<1x4x288xf32>
    %33 = vector.shape_cast %32 : vector<1x4x288xf32> to vector<4x288xf32>
    %34 = vector.shape_cast %33 : vector<4x288xf32> to vector<1x4x288xf32>
    %c1_20 = arith.constant 1 : index
    %c0_21 = arith.constant 0 : index
    %c0_22 = arith.constant 0 : index
    %35 = vector.load %arg4[%c1_20, %c0_21, %c0_22] : memref<4x4x288xf32, #tpu.memory_space<vmem>>, vector<1x4x288xf32>
    %36 = vector.shape_cast %35 : vector<1x4x288xf32> to vector<4x288xf32>
    %37 = vector.shape_cast %36 : vector<4x288xf32> to vector<1x4x288xf32>
    %38 = vector.broadcast %28 : vector<1x1x288xf32> to vector<1x4x288xf32>
    %39 = arith.mulf %38, %34 : vector<1x4x288xf32>
    %40 = arith.addf %19, %39 : vector<1x4x288xf32>
    %41 = vector.broadcast %31 : vector<1x1x288xf32> to vector<1x4x288xf32>
    %42 = arith.mulf %41, %37 : vector<1x4x288xf32>
    %43 = arith.subf %40, %42 : vector<1x4x288xf32>
    %44 = vector.broadcast %28 : vector<1x1x288xf32> to vector<1x4x288xf32>
    %45 = arith.mulf %44, %37 : vector<1x4x288xf32>
    %46 = arith.addf %25, %45 : vector<1x4x288xf32>
    %47 = vector.broadcast %31 : vector<1x1x288xf32> to vector<1x4x288xf32>
    %48 = arith.mulf %47, %34 : vector<1x4x288xf32>
    %49 = arith.addf %46, %48 : vector<1x4x288xf32>
    %c0_23 = arith.constant 0 : index
    %c2 = arith.constant 2 : index
    %c0_24 = arith.constant 0 : index
    %50 = vector.load %arg1[%c0_23, %c2, %c0_24] : memref<1x4x288xf32, #tpu.memory_space<vmem>>, vector<1x1x288xf32>
    %51 = vector.shape_cast %50 : vector<1x1x288xf32> to vector<1x288xf32>
    %52 = vector.shape_cast %51 : vector<1x288xf32> to vector<1x1x288xf32>
    %c0_25 = arith.constant 0 : index
    %c2_26 = arith.constant 2 : index
    %c0_27 = arith.constant 0 : index
    %53 = vector.load %arg2[%c0_25, %c2_26, %c0_27] : memref<1x4x288xf32, #tpu.memory_space<vmem>>, vector<1x1x288xf32>
    %54 = vector.shape_cast %53 : vector<1x1x288xf32> to vector<1x288xf32>
    %55 = vector.shape_cast %54 : vector<1x288xf32> to vector<1x1x288xf32>
    %c2_28 = arith.constant 2 : index
    %c0_29 = arith.constant 0 : index
    %c0_30 = arith.constant 0 : index
    %56 = vector.load %arg3[%c2_28, %c0_29, %c0_30] : memref<4x4x288xf32, #tpu.memory_space<vmem>>, vector<1x4x288xf32>
    %57 = vector.shape_cast %56 : vector<1x4x288xf32> to vector<4x288xf32>
    %58 = vector.shape_cast %57 : vector<4x288xf32> to vector<1x4x288xf32>
    %c2_31 = arith.constant 2 : index
    %c0_32 = arith.constant 0 : index
    %c0_33 = arith.constant 0 : index
    %59 = vector.load %arg4[%c2_31, %c0_32, %c0_33] : memref<4x4x288xf32, #tpu.memory_space<vmem>>, vector<1x4x288xf32>
    %60 = vector.shape_cast %59 : vector<1x4x288xf32> to vector<4x288xf32>
    %61 = vector.shape_cast %60 : vector<4x288xf32> to vector<1x4x288xf32>
    %62 = vector.broadcast %52 : vector<1x1x288xf32> to vector<1x4x288xf32>
    %63 = arith.mulf %62, %58 : vector<1x4x288xf32>
    %64 = arith.addf %43, %63 : vector<1x4x288xf32>
    %65 = vector.broadcast %55 : vector<1x1x288xf32> to vector<1x4x288xf32>
    %66 = arith.mulf %65, %61 : vector<1x4x288xf32>
    %67 = arith.subf %64, %66 : vector<1x4x288xf32>
    %68 = vector.broadcast %52 : vector<1x1x288xf32> to vector<1x4x288xf32>
    %69 = arith.mulf %68, %61 : vector<1x4x288xf32>
    %70 = arith.addf %49, %69 : vector<1x4x288xf32>
    %71 = vector.broadcast %55 : vector<1x1x288xf32> to vector<1x4x288xf32>
    %72 = arith.mulf %71, %58 : vector<1x4x288xf32>
    %73 = arith.addf %70, %72 : vector<1x4x288xf32>
    %c0_34 = arith.constant 0 : index
    %c3 = arith.constant 3 : index
    %c0_35 = arith.constant 0 : index
    %74 = vector.load %arg1[%c0_34, %c3, %c0_35] : memref<1x4x288xf32, #tpu.memory_space<vmem>>, vector<1x1x288xf32>
    %75 = vector.shape_cast %74 : vector<1x1x288xf32> to vector<1x288xf32>
    %76 = vector.shape_cast %75 : vector<1x288xf32> to vector<1x1x288xf32>
    %c0_36 = arith.constant 0 : index
    %c3_37 = arith.constant 3 : index
    %c0_38 = arith.constant 0 : index
    %77 = vector.load %arg2[%c0_36, %c3_37, %c0_38] : memref<1x4x288xf32, #tpu.memory_space<vmem>>, vector<1x1x288xf32>
    %78 = vector.shape_cast %77 : vector<1x1x288xf32> to vector<1x288xf32>
    %79 = vector.shape_cast %78 : vector<1x288xf32> to vector<1x1x288xf32>
    %c3_39 = arith.constant 3 : index
    %c0_40 = arith.constant 0 : index
    %c0_41 = arith.constant 0 : index
    %80 = vector.load %arg3[%c3_39, %c0_40, %c0_41] : memref<4x4x288xf32, #tpu.memory_space<vmem>>, vector<1x4x288xf32>
    %81 = vector.shape_cast %80 : vector<1x4x288xf32> to vector<4x288xf32>
    %82 = vector.shape_cast %81 : vector<4x288xf32> to vector<1x4x288xf32>
    %c3_42 = arith.constant 3 : index
    %c0_43 = arith.constant 0 : index
    %c0_44 = arith.constant 0 : index
    %83 = vector.load %arg4[%c3_42, %c0_43, %c0_44] : memref<4x4x288xf32, #tpu.memory_space<vmem>>, vector<1x4x288xf32>
    %84 = vector.shape_cast %83 : vector<1x4x288xf32> to vector<4x288xf32>
    %85 = vector.shape_cast %84 : vector<4x288xf32> to vector<1x4x288xf32>
    %86 = vector.broadcast %76 : vector<1x1x288xf32> to vector<1x4x288xf32>
    %87 = arith.mulf %86, %82 : vector<1x4x288xf32>
    %88 = arith.addf %67, %87 : vector<1x4x288xf32>
    %89 = vector.broadcast %79 : vector<1x1x288xf32> to vector<1x4x288xf32>
    %90 = arith.mulf %89, %85 : vector<1x4x288xf32>
    %91 = arith.subf %88, %90 : vector<1x4x288xf32>
    %92 = vector.broadcast %76 : vector<1x1x288xf32> to vector<1x4x288xf32>
    %93 = arith.mulf %92, %85 : vector<1x4x288xf32>
    %94 = arith.addf %73, %93 : vector<1x4x288xf32>
    %95 = vector.broadcast %79 : vector<1x1x288xf32> to vector<1x4x288xf32>
    %96 = arith.mulf %95, %82 : vector<1x4x288xf32>
    %97 = arith.addf %94, %96 : vector<1x4x288xf32>
    %c0_45 = arith.constant 0 : index
    %c0_46 = arith.constant 0 : index
    %c0_47 = arith.constant 0 : index
    %98 = vector.load %arg5[%c0_45, %c0_46, %c0_47] : memref<1x4x288xf32, #tpu.memory_space<vmem>>, vector<1x4x288xf32>
    tpu.vector_store %arg5[%c0_45, %c0_46, %c0_47], %91 {strides = array<i32>} : memref<1x4x288xf32, #tpu.memory_space<vmem>>, vector<1x4x288xf32>,
    %c0_48 = arith.constant 0 : index
    %c0_49 = arith.constant 0 : index
    %c0_50 = arith.constant 0 : index
    %99 = vector.load %arg6[%c0_48, %c0_49, %c0_50] : memref<1x4x288xf32, #tpu.memory_space<vmem>>, vector<1x4x288xf32>
    tpu.vector_store %arg6[%c0_48, %c0_49, %c0_50], %97 {strides = array<i32>} : memref<1x4x288xf32, #tpu.memory_space<vmem>>, vector<1x4x288xf32>,
    return
  }
  func.func @transform_0(%arg0: i32) -> (i32, i32, i32) {
    %c0_i32 = arith.constant 0 : i32
    %c0_i32_0 = arith.constant 0 : i32
    %c0_i32_1 = arith.constant 0 : i32
    return %arg0, %c0_i32, %c0_i32_0 : i32, i32, i32
  }
  func.func @transform_1(%arg0: i32) -> (i32, i32, i32) {
    %c0_i32 = arith.constant 0 : i32
    %c0_i32_0 = arith.constant 0 : i32
    %c0_i32_1 = arith.constant 0 : i32
    return %arg0, %c0_i32, %c0_i32_0 : i32, i32, i32
  }
  func.func @transform_2(%arg0: i32) -> (i32, i32, i32) {
    %c0_i32 = arith.constant 0 : i32
    %c0_i32_0 = arith.constant 0 : i32
    %c0_i32_1 = arith.constant 0 : i32
    %c0_i32_2 = arith.constant 0 : i32
    return %c0_i32, %c0_i32_0, %c0_i32_1 : i32, i32, i32
  }
  func.func @transform_3(%arg0: i32) -> (i32, i32, i32) {
    %c0_i32 = arith.constant 0 : i32
    %c0_i32_0 = arith.constant 0 : i32
    %c0_i32_1 = arith.constant 0 : i32
    %c0_i32_2 = arith.constant 0 : i32
    return %c0_i32, %c0_i32_0, %c0_i32_1 : i32, i32, i32
  }
  func.func @transform_4(%arg0: i32) -> (i32, i32, i32) {
    %c0_i32 = arith.constant 0 : i32
    %c0_i32_0 = arith.constant 0 : i32
    %c0_i32_1 = arith.constant 0 : i32
    return %arg0, %c0_i32, %c0_i32_0 : i32, i32, i32
  }
  func.func @transform_5(%arg0: i32) -> (i32, i32, i32) {
    %c0_i32 = arith.constant 0 : i32
    %c0_i32_0 = arith.constant 0 : i32
    %c0_i32_1 = arith.constant 0 : i32
    return %arg0, %c0_i32, %c0_i32_0 : i32, i32, i32
  }
}

</mosaic_0001>

<bundles_post_ra>
// kernel: tpu_custom_call.1
= control target key start
LH: loop header
LB: loop body
LE: loop exit
PB: predicated region body
PF: predicated region fallthrough
CT: control target
= control target key end

     0   :  { %11 = vsyncpa [#allocation3], 0  ;;  %s1693_s0 = inlined_call_operand.hbm [shape: f32[2,4,288], index: 0, kind: input, shape index: {}]   ;;  %s1694_s1 = inlined_call_operand.hbm [shape: f32[2,4,288], index: 1, kind: input, shape index: {}]   ;;  %s1695_s2 = inlined_call_operand.hbm [shape: f32[4,4,288], index: 2, kind: input, shape index: {}]   ;;  %s1696_s3 = inlined_call_operand.hbm [shape: f32[4,4,288], index: 3, kind: input, shape index: {}]   ;;  %s1697_s4 = inlined_call_operand.hbm [shape: f32[2,4,288], index: 4, kind: output, shape index: {0}]   ;;  %s1698_s5 = inlined_call_operand.hbm [shape: f32[2,4,288], index: 5, kind: output, shape index: {1}]  }
   0x1   :  { %13 = vsyncpa [#allocation3 + $0x1], 0 }
   0x2   :  { %14 = vsyncpa [#allocation6], 0 }
   0x3   :  { %16 = vsyncpa [#allocation6 + $0x1], 0 }
   0x4   :  { %17 = vsyncpa [#allocation9], 0 }
   0x5   :  { %18 = vsyncpa [#allocation4], 0 }
   0x6   :  { %20 = vsyncpa [#allocation4 + $0x1], 0 }
   0x7   :  { %21 = vsyncpa [#allocation12], 0 }
   0x8   :  { %23 = vsyncpa [#allocation12 + $0x1], 0  ;;  %s1174_s18 = smov 0   ;;  %s1176_s19 = smov 0  }
   0x9   :  { %s1178_s20 = smov 0   ;;  %s1180_s21 = smov 0  }
   0xa LB: > { %s1195_s22 = sadd.s32 4294967295, %s1134_s21   ;;  %s794_s23 = sadd.s32 4294967294, %s1134_s21   ;;  %s1134_s21 = sphi %s1180_s21, %s1729_s21   ;;  %s1130_s20 = sphi %s1178_s20, %s1728_s20   ;;  %s1126_s19 = sphi %s1176_s19, %s1727_s19   ;;  %s1122_s18 = sphi %s1174_s18, %s1726_s18  }
   0xb   : > { %p49_p0 = scmp.ne.s32.totalorder %s1126_s19, %s1122_s18  ;;  %p1699_p1 = scmp.eq.s32.totalorder %s1195_s22, 0 }
   0xc   : > { %p147_p3 = scmp.eq.s32.totalorder %s794_s23, 1  ;;  %p795_p5 = scmp.ge.s32.totalorder %s1134_s21, 1 }
   0xd   : > { %p1204_p4 = por %p1699_p1, %p49_p0  ;;  %p180_p7 = scmp.lt.s32.totalorder %s1134_s21, 3 }
   0xe   : > { %p1209_p6 = por %p147_p3, %p49_p0  ;;  %s1136_s27 = smov [#allocation7]  }
   0xf   : > { %s1705_s24 = scalar_select %p1204_p4, 1, 0 }
  0x10   : > { %s1706_s25 = scalar_select %p1209_p6, 1, 0 }
  0x11   : > { %p1214_p8 = pnand %p795_p5, %p180_p7  ;;  %s192_s28 = sshll.u32 %s1136_s27, 4  ;;  %s1218_s28 = int_to_ptr.vmem [resolvable:$true] %s192_s28 }
  0x12   : > { %s1137_s30 = smov [#allocation8]   ;;  %s908_s9 = scalar_lea.hbm %s1695_s2, 768 }
  0x13   : > { %s1707_s26 = scalar_select %p1214_p8, 1, 0 }
  0x14   : > { %p837_p9 = pneg %p1214_p8  ;;  %s205_s6 = sshll.u32 %s1137_s30, 4  ;;  %s1229_s6 = int_to_ptr.vmem [resolvable:$true] %s205_s6 }
  0x15   : > { %p909_p12 = scmp.ne.s32.totalorder %s1695_s2, %s908_s9  ;;  %p915_p5 = scmp.lt.u32.totalorder %s908_s9, %s1695_s2 }
  0x16   : > { %p1225_p11 = pnand %p837_p9, %p1699_p1 }
  0x18   : > { %p910_p13 = pneg %p1225_p11 }
  0x1a   : > { %p911_p0 = pnand %p910_p13, %p909_p12 }
  0x1c   : > { %p912_p3 = pneg %p911_p0 }
  0x1e   : > { %p917_p7 = pnand %p915_p5, %p912_p3 }
  0x20   : > { %920 = shalt.err (!%p917_p7)
}
  0x21   : > { %s921_s14 = scalar_lea.vmem %s1218_s28, 768  ;;  %p929_p2 = scmp.lt.s32.totalorder %s1218_s28, %s1218_s28 }
  0x22   : > { %p922_p9 = scmp.ne.s32.totalorder %s1218_s28, %s921_s14  ;;  %p930_p12 = scmp.lt.s32.totalorder %s921_s14, %s921_s14 }
  0x24   : > { %p924_p10 = pnand %p922_p9, %p910_p13  ;;  %p931_p0 = por %p930_p12, %p929_p2 }
  0x26   : > { %p925_p1 = pneg %p924_p10 }
  0x28   : > { %p932_p6 = pnand %p931_p0, %p925_p1 }
  0x2a   : > { %935 = shalt.err (!%p932_p6)
}
  0x2b   : > { %s1138_s15 = smov 192   ;;  %s1139_s16 = smov 12  }
  0x2c   : > { %840 = dma.hbm_to_vmem [thread:$0]  (!%p1225_p11), %s1695_s2, 768, %s1218_s28, [#allocation6], %s1138_s15, %s1138_s15, %s1139_s16  }
  0x2d   : > { %s936_s7 = scalar_lea.hbm %s1696_s3, 768 }
  0x2e   : > { %p937_p2 = scmp.ne.s32.totalorder %s1696_s3, %s936_s7  ;;  %p943_p10 = scmp.lt.u32.totalorder %s936_s7, %s1696_s3 }
  0x30   : > { %p939_p1 = pnand %p937_p2, %p910_p13 }
  0x32   : > { %p940_p6 = pneg %p939_p1 }
  0x34   : > { %p945_p3 = pnand %p943_p10, %p940_p6 }
  0x36   : > { %948 = shalt.err (!%p945_p3)
}
  0x37   : > { %s949_s28 = scalar_lea.vmem %s1229_s6, 768  ;;  %p957_p12 = scmp.lt.s32.totalorder %s1229_s6, %s1229_s6 }
  0x38   : > { %p950_p5 = scmp.ne.s32.totalorder %s1229_s6, %s949_s28  ;;  %p958_p0 = scmp.lt.s32.totalorder %s949_s28, %s949_s28 }
  0x3a   : > { %p952_p7 = pnand %p950_p5, %p910_p13  ;;  %p959_p2 = por %p958_p0, %p957_p12 }
  0x3c   : > { %p953_p9 = pneg %p952_p7 }
  0x3e   : > { %p960_p1 = pnand %p959_p2, %p953_p9 }
  0x40   : > { %963 = shalt.err (!%p960_p1)
}
  0x41   : > { %843 = dma.hbm_to_vmem [thread:$0]  (!%p1225_p11), %s1696_s3, 768, %s1229_s6, [#allocation9], %s1138_s15, %s1138_s15, %s1139_s16  }
  0x42   : > { %s1284_s14 = sadd.s32 1, %s1134_s21   ;;  %s36_s29 = sadd.s32 1, %s1130_s20 }
  0x43   : > { %s33_s17 = ssub.s32 %s1134_s21, %s1284_s14  ;;  %p43_p13 = scmp.ne.s32.totalorder %s1130_s20, %s1126_s19 }
  0x44   : > { %p34_p6 = scmp.eq.s32.totalorder %s33_s17, 0  ;;  %p44_p10 = scmp.eq.s32.totalorder %s1134_s21, 0 }
  0x45   : > { %p1709_p3 = scmp.eq.s32.totalorder %s1195_s22, 1  ;;  %p860_p7 = scmp.lt.s32.totalorder %s1134_s21, 2 }
  0x46   : > { %s1300_s27 = scalar_select %p34_p6, %s1130_s20, %s36_s29  }
  0x47   : > { %p1294_p5 = por %p1709_p3, %p43_p13  ;;  %p45_p9 = por %p44_p10, %p43_p13 }
  0x48   : > { %s219_s30 = sand.u32 1, %s1130_s20   ;;  %s815_s15 = smul.u32 192, %s1134_s21 }
  0x49   : > { %s1710_s23 = scalar_select %p1294_p5, 1, 0 }
  0x4a   : > { %s1303_s6 = smul.u32 12, %s219_s30  ;;  %p1306_p11 = pnand %p860_p7, %p45_p9 }
  0x4b   : > { %s1316_s10 = scalar_lea.hbm %s1693_s0, %s815_s15  ;;  %s220_s12 = scalar_lea.sflag [#allocation3], %s219_s30 }
  0x4c   : > { %s223_s11 = scalar_lea.vmem [#allocation2], %s1303_s6  ;;  %s964_s13 = scalar_lea.hbm %s1316_s10, 192 }
  0x4d   : > { %s231_s28 = sshll.u32 %s223_s11, 4  ;;  %p965_p12 = scmp.ne.s32.totalorder %s1316_s10, %s964_s13  ;;  %s1319_s28 = int_to_ptr.vmem [resolvable:$true] %s231_s28 }
  0x4e   : > { %p966_p0 = pneg %p1306_p11  ;;  %s969_s8 = scalar_lea.hbm %s1693_s0, 384 }
  0x4f   : > { %p970_p13 = scmp.lt.u32.totalorder %s1316_s10, %s1693_s0  ;;  %p971_p6 = scmp.lt.u32.totalorder %s969_s8, %s964_s13 }
  0x50   : > { %p967_p2 = pnand %p966_p0, %p965_p12  ;;  %p973_p3 = scmp.lt.u32.totalorder %s964_s13, %s1316_s10 }
  0x51   : > { %p972_p10 = por %p971_p6, %p970_p13 }
  0x52   : > { %p968_p1 = pneg %p967_p2 }
  0x53   : > { %p974_p7 = por %p973_p3, %p972_p10 }
  0x55   : > { %p975_p9 = pnand %p974_p7, %p968_p1 }
  0x57   : > { %978 = shalt.err (!%p975_p9)
}
  0x58   : > { %s979_s30 = scalar_lea.vmem %s1319_s28, 192  ;;  %s1140_s11 = smov [#allocation2]  }
  0x59   : > { %p980_p12 = scmp.ne.s32.totalorder %s1319_s28, %s979_s30  ;;  %s984_s29 = sshll.u32 %s1140_s11, 4  ;;  %s985_s29 = int_to_ptr.vmem [resolvable:$false] %s984_s29 }
  0x5a   : > { %s986_s7 = scalar_lea.vmem %s985_s29, 384  ;;  %p987_p4 = scmp.lt.s32.totalorder %s1319_s28, %s985_s29 }
  0x5b   : > { %p982_p2 = pnand %p980_p12, %p966_p0  ;;  %p988_p13 = scmp.lt.s32.totalorder %s986_s7, %s979_s30 }
  0x5d   : > { %p983_p5 = pneg %p982_p2  ;;  %p989_p6 = por %p988_p13, %p987_p4 }
  0x5f   : > { %p990_p10 = pnand %p989_p6, %p983_p5 }
  0x61   : > { %993 = shalt.err (!%p990_p10)
}
  0x62   : > { %847 = dma.hbm_to_vmem [thread:$0]  (!%p1306_p11), %s1316_s10, 192, %s1319_s28, %s220_s12  }
  0x63   : > { %s1351_s8 = scalar_lea.hbm %s1694_s1, %s815_s15  ;;  %s242_s9 = scalar_lea.vmem [#allocation5], %s1303_s6 }
  0x64   : > { %s250_s30 = sshll.u32 %s242_s9, 4  ;;  %s1712_s11 = sand.u32 1, %s1134_s21   ;;  %s251_s30 = int_to_ptr.vmem [resolvable:$true] %s250_s30 }
  0x65   : > { %s239_s29 = scalar_lea.sflag [#allocation6], %s1712_s11  ;;  %s994_s7 = scalar_lea.hbm %s1351_s8, 192 }
  0x66   : > { %p995_p4 = scmp.ne.s32.totalorder %s1351_s8, %s994_s7  ;;  %s999_s15 = scalar_lea.hbm %s1694_s1, 384 }
  0x67   : > { %p1000_p3 = scmp.lt.u32.totalorder %s1351_s8, %s1694_s1  ;;  %p1001_p7 = scmp.lt.u32.totalorder %s999_s15, %s994_s7 }
  0x68   : > { %p997_p5 = pnand %p995_p4, %p966_p0  ;;  %p1003_p12 = scmp.lt.u32.totalorder %s994_s7, %s1351_s8 }
  0x69   : > { %p1002_p9 = por %p1001_p7, %p1000_p3 }
  0x6a   : > { %p998_p1 = pneg %p997_p5 }
  0x6b   : > { %p1004_p2 = por %p1003_p12, %p1002_p9 }
  0x6d   : > { %p1005_p13 = pnand %p1004_p2, %p998_p1 }
  0x6f   : > { %1008 = shalt.err (!%p1005_p13)
}
  0x70   : > { %s1009_s6 = scalar_lea.vmem %s251_s30, 192  ;;  %s1141_s17 = smov [#allocation5]  }
  0x71   : > { %p1010_p6 = scmp.ne.s32.totalorder %s251_s30, %s1009_s6  ;;  %s1014_s9 = sshll.u32 %s1141_s17, 4  ;;  %s1015_s9 = int_to_ptr.vmem [resolvable:$false] %s1014_s9 }
  0x72   : > { %s1016_s11 = scalar_lea.vmem %s1015_s9, 384  ;;  %p1017_p5 = scmp.lt.s32.totalorder %s251_s30, %s1015_s9 }
  0x73   : > { %p1012_p10 = pnand %p1010_p6, %p966_p0  ;;  %p1018_p8 = scmp.lt.s32.totalorder %s1016_s11, %s1009_s6 }
  0x75   : > { %p1013_p4 = pneg %p1012_p10  ;;  %p1019_p3 = por %p1018_p8, %p1017_p5 }
  0x77   : > { %p1020_p7 = pnand %p1019_p3, %p1013_p4 }
  0x79   : > { %1023 = shalt.err (!%p1020_p7)
}
  0x7a   : > { %850 = dma.hbm_to_vmem [thread:$0]  (!%p1306_p11), %s1351_s8, 192, %s251_s30, %s239_s29  }
  0x7b   : > { %p1713_p1 = scmp.ne.s32.totalorder %s1707_s26, 0 }
  0x7d   : > { %259 = sbr.rel (%p1713_p1) target bundleno = 220 (0xdc), region = 36 }
  0x84   : > { %s1378_s7 = sand.u32 1, %s1126_s19   ;;  %p1714_p8 = scmp.ne.s32.totalorder %s1705_s24, 0 }
  0x85   : > { %s1381_s10 = smul.u32 12, %s1378_s7  ;;  %s262_s28 = scalar_lea.sflag [#allocation3], %s1378_s7 }
  0x87   : > { %s1385_s15 = scalar_lea.vmem [#allocation2], %s1381_s10 }
  0x88   : > { %1097 = dma.done.wait (%p1714_p8), %s262_s28, 192  }
  0x89   : > { %1099 = vsyncadd (%p1714_p8), %s262_s28, 4294967104  ;;  %s270_s26 = sand.u32 1, %s1195_s22   ;;  %s1393_s8 = scalar_lea.vmem [#allocation5], %s1381_s10 }
  0x8a   : > { %s271_s16 = scalar_lea.sflag [#allocation6], %s270_s26 }
  0x8b   : > { %1101 = dma.done.wait (%p1714_p8), %s271_s16, 192  }
  0x8c   : > { %1103 = vsyncadd (%p1714_p8), %s271_s16, 4294967104  ;;  %p1715_p11 = scmp.eq.s32.totalorder %s1195_s22, 0 }
  0x8e   : > { %1105 = dma.done.wait (%p1715_p11), [#allocation6], 768   ;;  %p1716_p0 = pmov %p1715_p11 }
  0x90   : > { %1107 = vsyncadd (%p1716_p0), [#allocation6], 4294966528  ;;  %p1717_p9 = pmov %p1716_p0 }
  0x91   : > { %p1718_p12 = pmov %p1716_p0 }
  0x92   : > { %1109 = dma.done.wait (%p1717_p9), [#allocation9], 768  }
  0x93   : > { %1111 = vsyncadd (%p1718_p12), [#allocation9], 4294966528  ;;  %v326_v0 = vlaneseq  ;;  %v1410_v5 = vld [vmem:[%s1385_s15] ss:$4 sm:$0x7]  ;;  %v1479_v36 = vld [vmem:[#allocation8 + $0x18] sm:$0xff] }
  0x94   : > { %v1413_v6 = vld [vmem:[%s1393_s8] ss:$4 sm:$0x7]  ;;  %v1415_v7 = vld [vmem:[#allocation7] sm:$0xff]  ;;  %v1505_v51 = vcombine.high %v1479_v36, %v1479_v36  ;;  %s1576_s24 = scalar_lea.vmem [#allocation10], %s1381_s10  ;;  %s819_s29 = smul.u32 192, %s1195_s22 }
  0x95   : > { %v327_v1 = vshrl.u32 %v326_v0, 7  ;;  %v1417_v8 = vld [vmem:[#allocation8] sm:$0xff]  ;;  %v1434_v14 = vcombine.high %v1415_v7, %v1415_v7  ;;  %v1443_v18 = vld [vmem:[#allocation8 + $0xc] sm:$0xff]  ;;  %v1497_v47 = vld [vmem:[#allocation7 + $0x24] sm:$0xff]  ;;  %s636_s30 = sshll.u32 %s1576_s24, 4  ;;  %vm608_vm0 = vcmask 257024   ;;  %s1599_s30 = int_to_ptr.vmem [resolvable:$true] %s636_s30 }
  0x96   : > { %v804_v13 = vld [vmem:[%s1385_s15 + $0x1] ss:$4 sm:$0x7]  ;;  %v1438_v15 = vcombine.high %v1417_v8, %v1417_v8  ;;  %v806_v25 = vld [vmem:[%s1385_s15 + $0x2] ss:$4 sm:$0x7]  ;;  %v1475_v34 = vcombine.high %v1443_v18, %v1443_v18  ;;  %v1519_v59 = vcombine.high %v1497_v47, %v1497_v47  ;;  %s1610_s6 = scalar_lea.hbm %s1697_s4, %s819_s29 }
  0x97   : > { %v328_v2 = vsub.s32 0, %v327_v1  ;;  %v332_v3 = vsub.s32 1, %v327_v1  ;;  %v1407_v4 = vsub.s32 2, %v327_v1  ;;  %v805_v16 = vld [vmem:[%s1393_s8 + $0x1] ss:$4 sm:$0x7] }
  0x98   : > { %v1441_v17 = vld [vmem:[#allocation7 + $0xc] sm:$0xff]  ;;  %v1469_v31 = vld [vmem:[#allocation7 + $0x18] sm:$0xff]  ;;  %1719 = vst [vmem:[#allocation19_spill] sm:$0xff] %v1519_v59  ;;  %v322_v1 = vld [vmem:[#allocation7 + $0x8] sm:$0xf]  ;;  %s617_s17 = scalar_lea.sflag [#allocation4], %s1378_s7 }
  0x99   : > { %v1420_v9 = vrot.slane %v1410_v5, %v328_v2  ;;  %v1423_v10 = vrot.slane %v1410_v5, %v332_v3  ;;  %v1426_v11 = vrot.slane %v1413_v6, %v328_v2  ;;  %v1429_v12 = vrot.slane %v1413_v6, %v332_v3  ;;  %v807_v30 = vld [vmem:[%s1393_s8 + $0x2] ss:$4 sm:$0x7]  ;;  %v808_v41 = vld [vmem:[%s1385_s15 + $0x3] ss:$4 sm:$0x7] }
  0x9a   : > { %v1445_v19 = vrot.slane %v804_v13, %v328_v2  ;;  %v1447_v20 = vrot.slane %v804_v13, %v332_v3  ;;  %v1455_v23 = vcombine.high %v1441_v17, %v1441_v17  ;;  %v1457_v24 = vrot.slane %v805_v16, %v328_v2  ;;  %v809_v46 = vld [vmem:[%s1393_s8 + $0x3] ss:$4 sm:$0x7]  ;;  %s1024_s9 = scalar_lea.vmem %s1599_s30, 192  ;;  %p1723_p13 = scmp.ne.s32.totalorder %s1710_s23, 0 }
  0x9b   : > { %v344_v21 = vmul.f32 %v1420_v9, %v1415_v7  ;;  %v369_v22 = vmul.f32 %v1426_v11, %v1417_v8  ;;  %v345_v26 = vmul.f32 %v1434_v14, %v1423_v10  ;;  %v370_v27 = vmul.f32 %v1438_v15, %v1429_v12  ;;  %v1507_v52 = vld [vmem:[#allocation8 + $0x24] sm:$0xff]  ;;  %p1025_p2 = scmp.ne.s32.totalorder %s1599_s30, %s1024_s9  ;;  %s1142_s11 = smov [#allocation10]  }
  0x9c   : > { %v416_v28 = vmul.f32 %v1445_v19, %v1441_v17  ;;  %v1466_v29 = vrot.slane %v805_v16, %v332_v3  ;;  %v417_v33 = vmul.f32 %v1455_v23, %v1447_v20  ;;  %v441_v35 = vmul.f32 %v1457_v24, %v1443_v18  ;;  %s1028_s28 = sshll.u32 %s1142_s11, 4  ;;  %s1029_s28 = int_to_ptr.vmem [resolvable:$false] %s1028_s28 }
  0x9d   : > { %v372_v32 = vsub.f32 %v344_v21, %v369_v22  ;;  %v373_v37 = vsub.f32 %v345_v26, %v370_v27  ;;  %v1481_v38 = vrot.slane %v806_v25, %v328_v2  ;;  %v1483_v39 = vrot.slane %v806_v25, %v332_v3  ;;  %p1026_p6 = pnand %p1025_p2, %p1723_p13  ;;  %s1030_s15 = scalar_lea.vmem %s1029_s28, 384 }
  0x9e   : > { %v1487_v40 = vcombine.high %v1469_v31, %v1469_v31  ;;  %v442_v43 = vmul.f32 %v1475_v34, %v1466_v29  ;;  %v1492_v44 = vrot.slane %v807_v30, %v328_v2  ;;  %v1494_v45 = vrot.slane %v807_v30, %v332_v3  ;;  %p1031_p4 = scmp.lt.s32.totalorder %s1599_s30, %s1029_s28  ;;  %p1032_p5 = scmp.lt.s32.totalorder %s1030_s15, %s1024_s9 }
  0x9f   : > { %v419_v42 = vadd.f32 %v416_v28, %v372_v32  ;;  %v420_v48 = vadd.f32 %v417_v33, %v373_v37  ;;  %v488_v49 = vmul.f32 %v1481_v38, %v1469_v31  ;;  %v1511_v55 = vrot.slane %v808_v41, %v328_v2  ;;  %v393_v28 = vld [vmem:[#allocation7 + $0x14] sm:$0xf]  ;;  %p1027_p10 = pneg %p1026_p6 }
  0xa0   : > { %v489_v50 = vmul.f32 %v1487_v40, %v1483_v39  ;;  %v513_v54 = vmul.f32 %v1492_v44, %v1479_v36  ;;  %v1513_v56 = vrot.slane %v808_v41, %v332_v3  ;;  %v514_v58 = vmul.f32 %v1505_v51, %v1494_v45  ;;  %p1033_p3 = por %p1032_p5, %p1031_p4 }
  0xa1   : > { %v444_v53 = vsub.f32 %v419_v42, %v441_v35  ;;  %v445_v57 = vsub.f32 %v420_v48, %v442_v43  ;;  %v1521_v60 = vrot.slane %v809_v46, %v328_v2  ;;  %v560_v62 = vmul.f32 %v1511_v55, %v1497_v47  ;;  %v324_v2 = vld [vmem:[#allocation8 + $0x8] sm:$0xf]  ;;  %v1543_v48 = vld [vmem:[#allocation7 + $0x20] sm:$0xf] }
  0xa2   : > { %v1525_v63 = vrot.slane %v809_v46, %v332_v3  ;;  %v1529_v0 = vcombine.high %v1507_v52, %v1507_v52  ;;  %v561_v22 = vmul.f32 %v1519_v59, %v1513_v56  ;;  %v337_v27 = vrot.slane %v1410_v5, %v1407_v4  ;;  %p1034_p7 = pnand %p1033_p3, %p1027_p10 }
  0xa3   : > { %v491_v61 = vadd.f32 %v488_v49, %v444_v53  ;;  %v492_v21 = vadd.f32 %v489_v50, %v445_v57  ;;  %v585_v26 = vmul.f32 %v1521_v60, %v1507_v52  ;;  %v362_v33 = vrot.slane %v1413_v6, %v1407_v4  ;;  %v396_v53 = vld [vmem:[#allocation8 + $0x14] sm:$0xf] }
  0xa4   : > { %1720 = vst [vmem:[#allocation20_spill] sm:$0xff] %v1525_v63  ;;  %v586_v3 = vmul.f32 %v1529_v0, %v1525_v63  ;;  %v409_v35 = vrot.slane %v804_v13, %v1407_v4  ;;  %v346_v42 = vmul.f32 %v337_v27, %v322_v1  ;;  %v434_v43 = vrot.slane %v805_v16, %v1407_v4  ;;  %v468_v13 = vld [vmem:[#allocation8 + $0x20] sm:$0xf] }
  0xa5   : > { %v516_v32 = vsub.f32 %v491_v61, %v513_v54  ;;  %v517_v37 = vsub.f32 %v492_v21, %v514_v58  ;;  %v481_v49 = vrot.slane %v806_v25, %v1407_v4  ;;  %v371_v5 = vmul.f32 %v362_v33, %v324_v2 }
  0xa6   : > { %v418_v54 = vmul.f32 %v409_v35, %v393_v28  ;;  %v1547_v57 = vrot.slane %v807_v30, %v1407_v4  ;;  %v443_v63 = vmul.f32 %v434_v43, %v396_v53  ;;  %v1551_v16 = vrot.slane %v808_v41, %v1407_v4 }
  0xa7   : > { %v563_v50 = vadd.f32 %v560_v62, %v516_v32  ;;  %v564_v61 = vadd.f32 %v561_v22, %v517_v37  ;;  %v374_v59 = vsub.f32 %v346_v42, %v371_v5  ;;  %v490_v58 = vmul.f32 %v481_v49, %v1543_v48  ;;  %v1558_v32 = vld [vmem:[#allocation7 + $0x2c] sm:$0xf] }
  0xa8   : > { %v515_v25 = vmul.f32 %v1547_v57, %v468_v13  ;;  %v375_v62 = vmul.f32 %v1420_v9, %v1417_v8  ;;  %v376_v30 = vmul.f32 %v1438_v15, %v1423_v10  ;;  %v381_v41 = vmul.f32 %v1426_v11, %v1415_v7 }
  0xa9   : > { %v588_v6 = vsub.f32 %v563_v50, %v585_v26  ;;  %v589_v21 = vsub.f32 %v564_v61, %v586_v3  ;;  %v421_v22 = vadd.f32 %v418_v54, %v374_v59  ;;  %v1561_v26 = vrot.slane %v809_v46, %v1407_v4 }
  0xaa   : > { %v382_v3 = vmul.f32 %v1429_v12, %v1434_v14  ;;  %v447_v42 = vmul.f32 %v1445_v19, %v1443_v18  ;;  %v448_v8 = vmul.f32 %v1475_v34, %v1447_v20  ;;  %v453_v9 = vmul.f32 %v1457_v24, %v1441_v17  ;;  %v1583_v14 = vld [vmem:[#allocation8 + $0x2c] sm:$0xf] }
  0xab   : > { %v605_v37 = vcombine.low %v588_v6, %v589_v21  ;;  %v446_v10 = vsub.f32 %v421_v22, %v443_v63  ;;  %v384_v15 = vadd.f32 %v381_v41, %v375_v62  ;;  %v454_v46 = vmul.f32 %v1466_v29, %v1455_v23 }
  0xac   : > { %v385_v4 = vadd.f32 %v382_v3, %v376_v30  ;;  %v562_v7 = vmul.f32 %v1551_v16, %v1558_v32  ;;  %v519_v11 = vmul.f32 %v1481_v38, %v1479_v36  ;;  %v520_v19 = vmul.f32 %v1505_v51, %v1483_v39 }
  0xad   : > { %607 = vst [vmem:[%s1576_s24] sm:$0xff] %v605_v37  ;;  %v493_v12 = vadd.f32 %v490_v58, %v446_v10  ;;  %v450_v17 = vadd.f32 %v447_v42, %v384_v15  ;;  %v587_v20 = vmul.f32 %v1561_v26, %v1583_v14  ;;  %v525_v23 = vmul.f32 %v1492_v44, %v1469_v31 }
  0xae   : > { %v451_v18 = vadd.f32 %v448_v8, %v385_v4  ;;  %v526_v24 = vmul.f32 %v1494_v45, %v1487_v40  ;;  %v377_v29 = vmul.f32 %v337_v27, %v324_v2  ;;  %v383_v59 = vmul.f32 %v362_v33, %v322_v1  ;;  %v1722_v1 = vld [vmem:[#allocation20_spill] sm:$0xff] }
  0xaf   : > { %v518_v34 = vsub.f32 %v493_v12, %v515_v25  ;;  %v456_v36 = vadd.f32 %v453_v9, %v450_v17  ;;  %v591_v63 = vmul.f32 %v1511_v55, %v1507_v52  ;;  %v592_v39 = vmul.f32 %v1529_v0, %v1513_v56  ;;  %v1721_v55 = vld [vmem:[#allocation19_spill] sm:$0xff] }
  0xb0   : > { %v457_v38 = vadd.f32 %v454_v46, %v451_v18  ;;  %v449_v51 = vmul.f32 %v409_v35, %v396_v53  ;;  %v455_v31 = vmul.f32 %v434_v43, %v393_v28  ;;  %v386_v45 = vadd.f32 %v383_v59, %v377_v29 }
  0xb1   : > { %v565_v44 = vadd.f32 %v562_v7, %v518_v34  ;;  %v522_v50 = vadd.f32 %v519_v11, %v456_v36  ;;  %v597_v52 = vmul.f32 %v1521_v60, %v1497_v47  ;;  %v598_v56 = vmul.f32 %v1722_v1, %v1721_v55 }
  0xb2   : > { %v523_v40 = vadd.f32 %v520_v19, %v457_v38  ;;  %v521_v0 = vmul.f32 %v481_v49, %v468_v13  ;;  %v452_v33 = vadd.f32 %v449_v51, %v386_v45  ;;  %v527_v43 = vmul.f32 %v1547_v57, %v1543_v48 }
  0xb3   : > { %v590_v2 = vsub.f32 %v565_v44, %v587_v20  ;;  %v528_v27 = vadd.f32 %v525_v23, %v522_v50 }
  0xb4   : > { %v529_v28 = vadd.f32 %v526_v24, %v523_v40  ;;  %v458_v60 = vadd.f32 %v455_v31, %v452_v33 }
  0xb5   : > { %609 = vst.msk [vmem:[%s1576_s24 + $0x8] sm:$0xf] %vm608_vm0, %v590_v2  ;;  %v594_v35 = vadd.f32 %v591_v63, %v528_v27 }
  0xb6   : > { %v595_v47 = vadd.f32 %v592_v39, %v529_v28 }
  0xb7   : > { %1037 = shalt.err (!%p1034_p7)
}
  0xb8   : > { %s1038_s26 = scalar_lea.hbm %s1610_s6, 192  ;;  %s1042_s24 = scalar_lea.hbm %s1697_s4, 384 }
  0xb9   : > { %p1039_p1 = scmp.ne.s32.totalorder %s1610_s6, %s1038_s26  ;;  %p1043_p0 = scmp.lt.u32.totalorder %s1610_s6, %s1697_s4 }
  0xba   : > { %p1044_p9 = scmp.lt.u32.totalorder %s1042_s24, %s1038_s26  ;;  %p1046_p2 = scmp.lt.u32.totalorder %s1038_s26, %s1610_s6 }
  0xbb   : > { %p1040_p8 = pnand %p1039_p1, %p1723_p13 }
  0xbc   : > { %p1045_p12 = por %p1044_p9, %p1043_p0 }
  0xbd   : > { %p1041_p11 = pneg %p1040_p8 }
  0xbe   : > { %p1047_p6 = por %p1046_p2, %p1045_p12 }
  0xc0   : > { %p1048_p10 = pnand %p1047_p6, %p1041_p11 }
  0xc2   : > { %1051 = shalt.err (!%p1048_p10)
}
  0xc3   : > { %833 = dma.vmem_to_hbm [thread:$0]  (%p1723_p13), %s1599_s30, 192, %s1610_s6, %s617_s17   ;;  %v600_v48 = vadd.f32 %v597_v52, %v594_v35  ;;  %v601_v49 = vadd.f32 %v598_v56, %v595_v47  ;;  %v524_v5 = vadd.f32 %v521_v0, %v458_v60  ;;  %v593_v53 = vmul.f32 %v1551_v16, %v1583_v14 }
  0xc4   : > { %s318_s9 = scalar_lea.vmem [#allocation11], %s1381_s10  ;;  %v599_v61 = vmul.f32 %v1561_v26, %v1558_v32  ;;  %s1650_s17 = scalar_lea.hbm %s1698_s5, %s819_s29 }
  0xc5   : > { %v612_v54 = vcombine.low %v600_v48, %v601_v49  ;;  %s650_s11 = sshll.u32 %s318_s9, 4  ;;  %v530_v57 = vadd.f32 %v527_v43, %v524_v5  ;;  %s622_s10 = scalar_lea.sflag [#allocation12], %s1378_s7  ;;  %s1643_s11 = int_to_ptr.vmem [resolvable:$true] %s650_s11 }
  0xc6   : > { %s1052_s28 = scalar_lea.vmem %s1643_s11, 192  ;;  %s1143_s15 = smov [#allocation11]  }
  0xc7   : > { %614 = vst [vmem:[%s318_s9] sm:$0xff] %v612_v54  ;;  %v596_v6 = vadd.f32 %v593_v53, %v530_v57  ;;  %p1053_p4 = scmp.ne.s32.totalorder %s1643_s11, %s1052_s28  ;;  %s1056_s26 = sshll.u32 %s1143_s15, 4  ;;  %s1057_s26 = int_to_ptr.vmem [resolvable:$false] %s1056_s26 }
  0xc8   : > { %s1058_s16 = scalar_lea.vmem %s1057_s26, 384  ;;  %p1059_p7 = scmp.lt.s32.totalorder %s1643_s11, %s1057_s26 }
  0xc9   : > { %v602_v13 = vadd.f32 %v599_v61, %v596_v6  ;;  %p1054_p5 = pnand %p1053_p4, %p1723_p13  ;;  %p1060_p1 = scmp.lt.s32.totalorder %s1058_s16, %s1052_s28 }
  0xcb   : > { %615 = vst.msk [vmem:[%s318_s9 + $0x8] sm:$0xf] %vm608_vm0, %v602_v13  ;;  %p1055_p3 = pneg %p1054_p5  ;;  %p1061_p8 = por %p1060_p1, %p1059_p7 }
  0xcd   : > { %p1062_p11 = pnand %p1061_p8, %p1055_p3 }
  0xcf   : > { %1065 = shalt.err (!%p1062_p11)
}
  0xd0   : > { %s1066_s22 = scalar_lea.hbm %s1650_s17, 192  ;;  %s1070_s8 = scalar_lea.hbm %s1698_s5, 384 }
  0xd1   : > { %p1067_p0 = scmp.ne.s32.totalorder %s1650_s17, %s1066_s22  ;;  %p1071_p2 = scmp.lt.u32.totalorder %s1650_s17, %s1698_s5 }
  0xd2   : > { %p1072_p6 = scmp.lt.u32.totalorder %s1070_s8, %s1066_s22  ;;  %p1074_p4 = scmp.lt.u32.totalorder %s1066_s22, %s1650_s17 }
  0xd3   : > { %p1068_p9 = pnand %p1067_p0, %p1723_p13 }
  0xd4   : > { %p1073_p10 = por %p1072_p6, %p1071_p2 }
  0xd5   : > { %p1069_p12 = pneg %p1068_p9 }
  0xd6   : > { %p1075_p5 = por %p1074_p4, %p1073_p10 }
  0xd8   : > { %p1076_p3 = pnand %p1075_p5, %p1069_p12 }
  0xda   : > { %1079 = shalt.err (!%p1076_p3)
}
  0xdb   : > { %834 = dma.vmem_to_hbm [thread:$0]  (%p1723_p13), %s1643_s11, 192, %s1650_s17, %s622_s10  }
  0xdc PF: > { %s662_s13 = sand.u32 1, %s1122_s18   ;;  %p1724_p7 = scmp.ne.s32.totalorder %s1706_s25, 0 }
  0xdd   : > { %p1725_p1 = scmp.ge.s32.totalorder %s1134_s21, 2  ;;  %s663_s9 = scalar_lea.sflag [#allocation4], %s662_s13 }
  0xdf   : > { %p852_p8 = pnand %p1725_p1, %p1724_p7 }
  0xe1   : > { %1113 = dma.done.wait (!%p852_p8), %s663_s9, 192  }
  0xe2   : > { %1115 = vsyncadd (!%p852_p8), %s663_s9, 4294967104  ;;  %s672_s30 = scalar_lea.sflag [#allocation12], %s662_s13 }
  0xe3   : > { %1117 = dma.done.wait (!%p852_p8), %s672_s30, 192  }
  0xe4   : > { %1119 = vsyncadd (!%p852_p8), %s672_s30, 4294967104  ;;  %p26_p13 = scmp.ge.s32.totalorder %s1284_s14, 4   ;;  %s1726_s18 = smov %s1126_s19 }
  0xe5   : > { %s1727_s19 = smov %s1130_s20  ;;  %s1728_s20 = smov %s1300_s27 }
  0xe6   : > { %s1729_s21 = smov %s1284_s14  ;;  %28 = sbr.rel (!%p26_p13) target bundleno = 10 (0xa), region = 131 }
  0xed   :  { %677 = vsyncpa [#allocation3], 1 }
  0xee   :  { %679 = vsyncpa [#allocation3 + $0x1], 1 }
  0xef   :  { %680 = vsyncpa [#allocation6], 1 }
  0xf0   :  { %682 = vsyncpa [#allocation6 + $0x1], 1 }
  0xf1   :  { %683 = vsyncpa [#allocation9], 1 }
  0xf2   :  { %684 = vsyncpa [#allocation4], 1 }
  0xf3   :  { %686 = vsyncpa [#allocation4 + $0x1], 1 }
  0xf4   :  { %687 = vsyncpa [#allocation12], 1 }
  0xf5   :  { %689 = vsyncpa [#allocation12 + $0x1], 1 }

</bundles_post_ra>
